<compile_context>
chip_gen: v5e
topology: v5e:2x2
jax: 0.10.0
libtpu: 0.0.40
codegen_flags: <defaults>
</compile_context>

<pallas_src>
import jax
import jax.numpy as jnp
from jax.experimental import pallas as pl
from jax.experimental.pallas import tpu as pltpu

_SINGLE_BLOCK_MAX_B = 2048   # x block = B*784*4 B ≈ 6.4 MB at the cap -> fits all chips
_BATCH_TILE = 2048           # tiled path: ~13 MB double-buffered x, >90% of HBM roofline


def linear_kernel(x_ref, w_ref, b_ref, o_ref):
    # x_ref: (TB, D) f32   w_ref: (D, C) f32   b_ref: (1, C) f32   o_ref: (TB, C) f32
    # bf16 cast happens on the VPU (huge slack, hidden under the DMA); MXU accumulates f32.
    x = x_ref[...].astype(jnp.bfloat16)
    w = w_ref[...].astype(jnp.bfloat16)
    logits = jnp.dot(x, w, preferred_element_type=jnp.float32)
    o_ref[...] = logits + b_ref[...]


def linear_classifier_forward(x, weight, bias, *,
                              single_block_max_b=_SINGLE_BLOCK_MAX_B,
                              batch_tile=_BATCH_TILE):
    """x: (B, C, H, W) or (B, H, W); weight: (D, num_classes); bias: (num_classes,)."""
    B = x.shape[0]
    x_flat = x.reshape(B, -1).astype(jnp.float32)   # nn.Flatten; metadata-only for f32 input
    D, C = weight.shape
    assert x_flat.shape[1] == D, "flattened input size must match weight's input dim"
    w = weight.astype(jnp.float32)
    b = bias.astype(jnp.float32).reshape(1, C)

    cost = pl.CostEstimate(
        flops=2 * B * D * C,
        transcendentals=0,
        bytes_accessed=B * D * 4 + D * C * 4 + C * 4 + B * C * 4,
    )

    if B <= single_block_max_b:
        # Small/medium batch: single full-array blocks, everything resident in VMEM,
        # no grid machinery, no padding along any dim.
        return pl.pallas_call(
            linear_kernel,
            out_shape=jax.ShapeDtypeStruct((B, C), jnp.float32),
            in_specs=[
                pl.BlockSpec(memory_space=pltpu.MemorySpace.VMEM),
                pl.BlockSpec(memory_space=pltpu.MemorySpace.VMEM),
                pl.BlockSpec(memory_space=pltpu.MemorySpace.VMEM),
            ],
            out_specs=pl.BlockSpec(memory_space=pltpu.MemorySpace.VMEM),
            cost_estimate=cost,
        )(x_flat, w, b)

    # Large batch: tile the batch dim, mark it "parallel" (megacore split on v7x) and
    # let BlockSpec double-buffer the x tile so its DMA overlaps the (tiny) matmul.
    # grid = cdiv(B, TB): Pallas clamps the trailing block's DMAs and masks its stores,
    # so no HBM traffic is wasted on padding rows.
    TB = batch_tile
    return pl.pallas_call(
        linear_kernel,
        out_shape=jax.ShapeDtypeStruct((B, C), jnp.float32),
        grid_spec=pltpu.PrefetchScalarGridSpec(
            num_scalar_prefetch=0,
            grid=(pl.cdiv(B, TB),),
            in_specs=[
                pl.BlockSpec((TB, D), lambda i: (i, 0)),
                pl.BlockSpec((D, C), lambda i: (0, 0)),   # weight resident across steps
                pl.BlockSpec((1, C), lambda i: (0, 0)),   # bias resident across steps
            ],
            out_specs=pl.BlockSpec((TB, C), lambda i: (i, 0)),
        ),
        compiler_params=pltpu.CompilerParams(
            dimension_semantics=("parallel",),
            vmem_limit_bytes=32 * 1024 * 1024,   # raise v5e's 16 MiB default; = default on v6e/v7x
        ),
        cost_estimate=cost,
    )(x_flat, w, b)


if __name__ == "__main__":
    # Config mirroring the PyTorch module: image_size=(28, 28), num_classes=10.
    batch_size = 8
    image_size = (28, 28)
    num_classes = 10
    in_features = image_size[0] * image_size[1]  # 784

    key = jax.random.PRNGKey(0)
    kx, kw, kb, kx2 = jax.random.split(key, 4)

    # Deterministic parameter init (PyTorch nn.Linear default: U(-1/sqrt(in), 1/sqrt(in))).
    bound = 1.0 / (in_features ** 0.5)
    weight = jax.random.uniform(kw, (in_features, num_classes),
                                minval=-bound, maxval=bound, dtype=jnp.float32)
    bias = jax.random.uniform(kb, (num_classes,),
                              minval=-bound, maxval=bound, dtype=jnp.float32)

    # MNIST-like NCHW batch (B, 1, 28, 28).
    x = jax.random.normal(kx, (batch_size, 1, image_size[0], image_size[1]),
                          dtype=jnp.float32)

    logits = jax.block_until_ready(linear_classifier_forward(x, weight, bias))
    assert logits.shape == (batch_size, num_classes)

    # Tight check against the same bf16-rounded operands (matches kernel MXU math).
    xb = x.reshape(batch_size, -1).astype(jnp.bfloat16).astype(jnp.float32)
    wb = weight.astype(jnp.bfloat16).astype(jnp.float32)
    ref = jnp.dot(xb, wb, precision=jax.lax.Precision.HIGHEST) + bias
    assert jnp.allclose(logits, ref, atol=2e-3, rtol=2e-3)

    # Loose check against full-f32 nn.Linear semantics (bf16 operand rounding only).
    ref_f32 = jnp.dot(x.reshape(batch_size, -1), weight,
                      precision=jax.lax.Precision.HIGHEST) + bias
    assert jnp.allclose(logits, ref_f32, atol=1e-1, rtol=1e-1)

    # Exercise the batch-tiled ("parallel") path, including the masked trailing block,
    # at a tiny size by overriding the thresholds: B=40, TB=16 -> grid=3, last block
    # only half-valid (tests boundary clamping/masking without a huge batch).
    B2 = 40
    x2 = jax.random.normal(kx2, (B2, 1, image_size[0], image_size[1]), dtype=jnp.float32)
    logits2 = jax.block_until_ready(
        linear_classifier_forward(x2, weight, bias, single_block_max_b=8, batch_tile=16))
    xb2 = x2.reshape(B2, -1).astype(jnp.bfloat16).astype(jnp.float32)
    ref2 = jnp.dot(xb2, wb, precision=jax.lax.Precision.HIGHEST) + bias
    assert logits2.shape == (B2, num_classes)
    assert jnp.allclose(logits2, ref2, atol=2e-3, rtol=2e-3)

    print("KERNEL_OK")
</pallas_src>

<mosaic_0001>
module attributes {stable_mosaic.version = 11 : i64} {
  func.func @linear_kernel(%arg0: memref<8x784xf32, #tpu.memory_space<vmem>>, %arg1: memref<784x10xf32, #tpu.memory_space<vmem>>, %arg2: memref<1x10xf32, #tpu.memory_space<vmem>>, %arg3: memref<8x10xf32, #tpu.memory_space<vmem>>) attributes {dimension_semantics = [], scalar_prefetch = 0 : i64, scratch_operands = 0 : i64, tpu.core_type = #tpu.core_type<tc>} {
    %c0 = arith.constant 0 : index
    %c0_0 = arith.constant 0 : index
    %0 = vector.load %arg0[%c0, %c0_0] : memref<8x784xf32, #tpu.memory_space<vmem>>, vector<8x784xf32>
    %1 = arith.truncf %0 : vector<8x784xf32> to vector<8x784xbf16>
    %c0_1 = arith.constant 0 : index
    %c0_2 = arith.constant 0 : index
    %2 = vector.load %arg1[%c0_1, %c0_2] : memref<784x10xf32, #tpu.memory_space<vmem>>, vector<784x10xf32>
    %3 = arith.truncf %2 : vector<784x10xf32> to vector<784x10xbf16>
    %cst = arith.constant dense<0.000000e+00> : vector<8x10xf32>
    %4 = tpu.matmul %1, %3, %cst {dimension_numbers = #tpu.dot_dimension_numbers<[1], [0], [0], [1], [0, 0, 1, 1], [], []>} : vector<8x784xbf16>, vector<784x10xbf16>, vector<8x10xf32> -> vector<8x10xf32>
    %c0_3 = arith.constant 0 : index
    %c0_4 = arith.constant 0 : index
    %5 = vector.load %arg2[%c0_3, %c0_4] : memref<1x10xf32, #tpu.memory_space<vmem>>, vector<1x10xf32>
    %6 = vector.broadcast %5 : vector<1x10xf32> to vector<8x10xf32>
    %7 = arith.addf %4, %6 : vector<8x10xf32>
    %c0_5 = arith.constant 0 : index
    %c0_6 = arith.constant 0 : index
    %8 = vector.load %arg3[%c0_5, %c0_6] : memref<8x10xf32, #tpu.memory_space<vmem>>, vector<8x10xf32>
    tpu.vector_store %arg3[%c0_5, %c0_6], %7 {strides = array<i32>} : memref<8x10xf32, #tpu.memory_space<vmem>>, vector<8x10xf32>,
    return
  }
}

</mosaic_0001>

<bundles_post_ra>
// kernel: tpu_custom_call.1
= control target key start
LH: loop header
LB: loop body
LE: loop exit
PB: predicated region body
PF: predicated region fallthrough
CT: control target
= control target key end

     0   :  { %s665_s0 = inlined_call_operand.vmem [shape: f32[8,784], index: 0, kind: input, shape index: {}]   ;;  %s666_s1 = inlined_call_operand.vmem [shape: f32[784,10], index: 1, kind: input, shape index: {}]   ;;  %s667_s2 = inlined_call_operand.vmem [shape: f32[1,10], index: 2, kind: input, shape index: {}]   ;;  %s668_s3 = inlined_call_operand.hbm [shape: f32[8,10], index: 3, kind: output, shape index: {}]  }
   0x1   :  { %v44_v0 = vld [vmem:[%s666_s1 + $0x70] sm:$0xff]  ;;  %v45_v1 = vld [vmem:[%s666_s1 + $0x78] sm:$0xff]  ;;  %v42_v9 = vld [vmem:[%s666_s1 + $0x60] sm:$0xff] }
   0x2   :  { %v60_v2 = vld [vmem:[%s666_s1 + $0xf0] sm:$0xff]  ;;  %v135_v3 = vpack.c.bf16 %v45_v1, %v44_v0  ;;  %v61_v4 = vld [vmem:[%s666_s1 + $0xf8] sm:$0xff]  ;;  %v43_v10 = vld [vmem:[%s666_s1 + $0x68] sm:$0xff] }
   0x3   :  { %v76_v5 = vld [vmem:[%s666_s1 + $0x170] sm:$0xff]  ;;  %v77_v6 = vld [vmem:[%s666_s1 + $0x178] sm:$0xff]  ;;  %v143_v7 = vpack.c.bf16 %v61_v4, %v60_v2  ;;  %v58_v11 = vld [vmem:[%s666_s1 + $0xe0] sm:$0xff]  ;;  %v134_v12 = vpack.c.bf16 %v43_v10, %v42_v9 }
   0x4   :  { %v151_v8 = vpack.c.bf16 %v77_v6, %v76_v5  ;;  %185 = vmatpush.bf16.msra.mxu0 %v135_v3  ;;  %v59_v13 = vld [vmem:[%s666_s1 + $0xe8] sm:$0xff]  ;;  %v74_v14 = vld [vmem:[%s666_s1 + $0x160] sm:$0xff]  ;;  %v40_v18 = vld [vmem:[%s666_s1 + $0x50] sm:$0xff] }
   0x5   :  { %v75_v15 = vld [vmem:[%s666_s1 + $0x168] sm:$0xff]  ;;  %198 = vmatpush.bf16.msra.mxu1 %v143_v7  ;;  %v142_v16 = vpack.c.bf16 %v59_v13, %v58_v11  ;;  %v41_v19 = vld [vmem:[%s666_s1 + $0x58] sm:$0xff]  ;;  %v56_v20 = vld [vmem:[%s666_s1 + $0xd0] sm:$0xff] }
   0x6   :  { %211 = vmatpush.bf16.msra.mxu2 %v151_v8  ;;  %v150_v17 = vpack.c.bf16 %v75_v15, %v74_v14  ;;  %v57_v21 = vld [vmem:[%s666_s1 + $0xd8] sm:$0xff]  ;;  %v72_v22 = vld [vmem:[%s666_s1 + $0x150] sm:$0xff]  ;;  %v133_v26 = vpack.c.bf16 %v41_v19, %v40_v18  ;;  %v38_v28 = vld [vmem:[%s666_s1 + $0x40] sm:$0xff] }
   0x7   :  { %v73_v23 = vld [vmem:[%s666_s1 + $0x158] sm:$0xff]  ;;  %v92_v24 = vld [vmem:[%s666_s1 + $0x1f0] sm:$0xff]  ;;  %v39_v29 = vld [vmem:[%s666_s1 + $0x48] sm:$0xff]  ;;  %v141_v30 = vpack.c.bf16 %v57_v21, %v56_v20 }
   0x8   :  { %v93_v25 = vld [vmem:[%s666_s1 + $0x1f8] sm:$0xff]  ;;  %186 = vmatpush.bf16.msra.mxu0 %v134_v12  ;;  %v149_v31 = vpack.c.bf16 %v73_v23, %v72_v22  ;;  %v54_v32 = vld [vmem:[%s666_s1 + $0xc0] sm:$0xff]  ;;  %v55_v33 = vld [vmem:[%s666_s1 + $0xc8] sm:$0xff]  ;;  %v132_v39 = vpack.c.bf16 %v39_v29, %v38_v28 }
   0x9   :  { %v159_v27 = vpack.c.bf16 %v93_v25, %v92_v24  ;;  %199 = vmatpush.bf16.msra.mxu1 %v142_v16  ;;  %v90_v34 = vld [vmem:[%s666_s1 + $0x1e0] sm:$0xff]  ;;  %v71_v36 = vld [vmem:[%s666_s1 + $0x148] sm:$0xff]  ;;  %v88_v40 = vld [vmem:[%s666_s1 + $0x1d0] sm:$0xff]  ;;  %v140_v42 = vpack.c.bf16 %v55_v33, %v54_v32 }
   0xa   :  { %212 = vmatpush.bf16.msra.mxu2 %v150_v17  ;;  %v70_v35 = vld [vmem:[%s666_s1 + $0x140] sm:$0xff]  ;;  %v91_v37 = vld [vmem:[%s666_s1 + $0x1e8] sm:$0xff]  ;;  %v89_v41 = vld [vmem:[%s666_s1 + $0x1d8] sm:$0xff] }
   0xb   :  { %224 = vmatpush.bf16.msra.mxu3 %v159_v27  ;;  %v158_v38 = vpack.c.bf16 %v91_v37, %v90_v34  ;;  %v148_v43 = vpack.c.bf16 %v71_v36, %v70_v35  ;;  %v36_v44 = vld [vmem:[%s666_s1 + $0x30] sm:$0xff]  ;;  %v37_v45 = vld [vmem:[%s666_s1 + $0x38] sm:$0xff]  ;;  %v157_v50 = vpack.c.bf16 %v89_v41, %v88_v40  ;;  %v86_v51 = vld [vmem:[%s666_s1 + $0x1c0] sm:$0xff] }
   0xc   :  { %187 = vmatpush.bf16.msra.mxu0 %v133_v26  ;;  %v52_v46 = vld [vmem:[%s666_s1 + $0xb0] sm:$0xff]  ;;  %v53_v47 = vld [vmem:[%s666_s1 + $0xb8] sm:$0xff]  ;;  %v87_v52 = vld [vmem:[%s666_s1 + $0x1c8] sm:$0xff]  ;;  %v131_v53 = vpack.c.bf16 %v37_v45, %v36_v44 }
   0xd   :  { %200 = vmatpush.bf16.msra.mxu1 %v141_v30  ;;  %v68_v48 = vld [vmem:[%s666_s1 + $0x130] sm:$0xff]  ;;  %v69_v49 = vld [vmem:[%s666_s1 + $0x138] sm:$0xff]  ;;  %v139_v54 = vpack.c.bf16 %v53_v47, %v52_v46  ;;  %v34_v56 = vld [vmem:[%s666_s1 + $0x20] sm:$0xff]  ;;  %v156_v62 = vpack.c.bf16 %v87_v52, %v86_v51 }
   0xe   :  { %213 = vmatpush.bf16.msra.mxu2 %v149_v31  ;;  %v147_v55 = vpack.c.bf16 %v69_v49, %v68_v48  ;;  %v35_v57 = vld [vmem:[%s666_s1 + $0x28] sm:$0xff]  ;;  %v50_v58 = vld [vmem:[%s666_s1 + $0xa0] sm:$0xff]  ;;  %v84_v63 = vld [vmem:[%s666_s1 + $0x1b0] sm:$0xff] }
   0xf   :  { %225 = vmatpush.bf16.msra.mxu3 %v158_v38  ;;  %v51_v59 = vld [vmem:[%s666_s1 + $0xa8] sm:$0xff]  ;;  %v66_v60 = vld [vmem:[%s666_s1 + $0x120] sm:$0xff]  ;;  %v85_v0 = vld [vmem:[%s666_s1 + $0x1b8] sm:$0xff]  ;;  %v130_v1 = vpack.c.bf16 %v35_v57, %v34_v56 }
  0x10   :  { %188 = vmatpush.bf16.msra.mxu0 %v132_v39  ;;  %v67_v61 = vld [vmem:[%s666_s1 + $0x128] sm:$0xff]  ;;  %v138_v2 = vpack.c.bf16 %v51_v59, %v50_v58  ;;  %v32_v4 = vld [vmem:[%s666_s1 + $0x10] sm:$0xff]  ;;  %v33_v5 = vld [vmem:[%s666_s1 + $0x18] sm:$0xff]  ;;  %v155_v10 = vpack.c.bf16 %v85_v0, %v84_v63 }
  0x11   :  { %201 = vmatpush.bf16.msra.mxu1 %v140_v42  ;;  %v146_v3 = vpack.c.bf16 %v67_v61, %v66_v60  ;;  %v48_v6 = vld [vmem:[%s666_s1 + $0x90] sm:$0xff]  ;;  %v49_v7 = vld [vmem:[%s666_s1 + $0x98] sm:$0xff]  ;;  %v82_v11 = vld [vmem:[%s666_s1 + $0x1a0] sm:$0xff]  ;;  %v129_v13 = vpack.c.bf16 %v33_v5, %v32_v4 }
  0x12   :  { %214 = vmatpush.bf16.msra.mxu2 %v148_v43  ;;  %v64_v8 = vld [vmem:[%s666_s1 + $0x110] sm:$0xff]  ;;  %v65_v9 = vld [vmem:[%s666_s1 + $0x118] sm:$0xff]  ;;  %v83_v12 = vld [vmem:[%s666_s1 + $0x1a8] sm:$0xff]  ;;  %v137_v15 = vpack.c.bf16 %v49_v7, %v48_v6 }
  0x13   :  { %226 = vmatpush.bf16.msra.mxu3 %v157_v50  ;;  %v30_v14 = vld [vmem:[%s666_s1] sm:$0xff]  ;;  %v145_v16 = vpack.c.bf16 %v65_v9, %v64_v8  ;;  %v31_v17 = vld [vmem:[%s666_s1 + $0x8] sm:$0xff]  ;;  %v154_v22 = vpack.c.bf16 %v83_v12, %v82_v11  ;;  %v108_v23 = vld [vmem:[%s666_s1 + $0x270] sm:$0xff] }
  0x14   :  { %189 = vmatpush.bf16.msra.mxu0 %v131_v53  ;;  %v46_v18 = vld [vmem:[%s666_s1 + $0x80] sm:$0xff]  ;;  %v47_v19 = vld [vmem:[%s666_s1 + $0x88] sm:$0xff]  ;;  %v109_v24 = vld [vmem:[%s666_s1 + $0x278] sm:$0xff]  ;;  %v128_v27 = vpack.c.bf16 %v31_v17, %v30_v14 }
  0x15   :  { %202 = vmatpush.bf16.msra.mxu1 %v139_v54  ;;  %v62_v20 = vld [vmem:[%s666_s1 + $0x100] sm:$0xff]  ;;  %v63_v21 = vld [vmem:[%s666_s1 + $0x108] sm:$0xff]  ;;  %v124_v25 = vld [vmem:[%s666_s1 + $0x2f0] sm:$0xff]  ;;  %v136_v31 = vpack.c.bf16 %v47_v19, %v46_v18  ;;  %v167_v35 = vpack.c.bf16 %v109_v24, %v108_v23 }
  0x16   :  { %215 = vmatpush.bf16.msra.mxu2 %v147_v55  ;;  %v125_v26 = vld [vmem:[%s666_s1 + $0x2f8] sm:$0xff]  ;;  %v80_v28 = vld [vmem:[%s666_s1 + $0x190] sm:$0xff]  ;;  %v16_v30 = vld [vmem:[%s665_s0] sm:$0xff]  ;;  %v144_v32 = vpack.c.bf16 %v63_v21, %v62_v20 }
  0x17   :  { %227 = vmatpush.bf16.msra.mxu3 %v156_v62  ;;  %v81_v29 = vld [vmem:[%s666_s1 + $0x198] sm:$0xff]  ;;  %v18_v33 = vld [vmem:[%s665_s0 + $0x10] sm:$0xff]  ;;  %v17_v34 = vld [vmem:[%s665_s0 + $0x8] sm:$0xff]  ;;  %v175_v36 = vpack.c.bf16 %v125_v26, %v124_v25  ;;  %v23_v44 = vpack.c.bf16 %v16_v30, %v16_v30 }
  0x18   :  { %190 = vmatpush.bf16.msra.mxu0 %v130_v1  ;;  %v106_v37 = vld [vmem:[%s666_s1 + $0x260] sm:$0xff]  ;;  %v127_v39 = vld [vmem:[%s666_s1 + $0x308] sm:$0xff]  ;;  %v153_v40 = vpack.c.bf16 %v81_v29, %v80_v28  ;;  %v25_v45 = vpack.c.bf16 %v18_v33, %v18_v33  ;;  %v24_v46 = vpack.c.bf16 %v17_v34, %v17_v34  ;;  %v104_v52 = vld [vmem:[%s666_s1 + $0x250] sm:$0xff] }
  0x19   :  { %203 = vmatpush.bf16.msra.mxu1 %v138_v2  ;;  %v126_v38 = vld [vmem:[%s666_s1 + $0x300] sm:$0xff]  ;;  %v107_v41 = vld [vmem:[%s666_s1 + $0x268] sm:$0xff]  ;;  %v105_v54 = vld [vmem:[%s666_s1 + $0x258] sm:$0xff] }
  0x1a   :  { %216 = vmatpush.bf16.msra.mxu2 %v146_v3  ;;  %v122_v42 = vld [vmem:[%s666_s1 + $0x2e0] sm:$0xff]  ;;  %v123_v43 = vld [vmem:[%s666_s1 + $0x2e8] sm:$0xff]  ;;  %v176_v49 = vpack.c.bf16 %v127_v39, %v126_v38  ;;  %v166_v50 = vpack.c.bf16 %v107_v41, %v106_v37  ;;  %v120_v55 = vld [vmem:[%s666_s1 + $0x2d0] sm:$0xff] }
  0x1b   :  { %228 = vmatpush.bf16.msra.mxu3 %v155_v10  ;;  %v78_v47 = vld [vmem:[%s666_s1 + $0x180] sm:$0xff]  ;;  %v79_v48 = vld [vmem:[%s666_s1 + $0x188] sm:$0xff]  ;;  %v174_v51 = vpack.c.bf16 %v123_v43, %v122_v42  ;;  %v121_v56 = vld [vmem:[%s666_s1 + $0x2d8] sm:$0xff] }
  0x1c   :  { %191 = vmatpush.bf16.msra.mxu0 %v129_v13  ;;  %v152_v53 = vpack.c.bf16 %v79_v48, %v78_v47  ;;  %v19_v57 = vld [vmem:[%s665_s0 + $0x18] sm:$0xff] }
  0x1d   :  { %204 = vmatpush.bf16.msra.mxu1 %v137_v15 }
  0x1e   :  { %217 = vmatpush.bf16.msra.mxu2 %v145_v16 }
  0x1f   :  { %229 = vmatpush.bf16.msra.mxu3 %v154_v22 }
  0x20   :  { %192 = vmatpush.bf16.msra.mxu0 %v128_v27 }
  0x21   :  { %205 = vmatpush.bf16.msra.mxu1 %v136_v31 }
  0x22   :  { %218 = vmatpush.bf16.msra.mxu2 %v144_v32 }
  0x23   :  { %230 = vmatpush.bf16.msra.mxu3 %v153_v40  ;;  %193 = vmatmul.bf16.vlgmr.msra.gmra.mxu0 %v23_v44 }
  0x24   :  { %237 = vmatpush.bf16.msrb.mxu0 %v167_v35  ;;  %206 = vmatmul.bf16.vlgmr.msra.gmra.mxu1 %v24_v46 }
  0x25   :  { %250 = vmatpush.bf16.msrb.mxu1 %v175_v36  ;;  %219 = vmatmul.bf16.vlgmr.msra.gmra.mxu2 %v25_v45 }
  0x26   :  { %8 = vsyncpa [#allocation3], 0  ;;  %270 = vmatpush.bf16.msrb.mxu2 %v176_v49  ;;  %v165_v58 = vpack.c.bf16 %v105_v54, %v104_v52  ;;  %v173_v59 = vpack.c.bf16 %v121_v56, %v120_v55  ;;  %v102_v60 = vld [vmem:[%s666_s1 + $0x240] sm:$0xff]  ;;  %v26_v61 = vpack.c.bf16 %v19_v57, %v19_v57  ;;  %v103_v62 = vld [vmem:[%s666_s1 + $0x248] sm:$0xff]  ;;  %vm181_vm0 = vcmask 130048   ;;  %s285_s10 = sshll.u32 %s668_s3, 4  ;;  %s286_s10 = int_to_ptr.hbm [resolvable:$true] %s285_s10 }
  0x27   :  { %231 = vmatpush.bf16.msra.mxu3 %v152_v53  ;;  %v118_v63 = vld [vmem:[%s666_s1 + $0x2c0] sm:$0xff]  ;;  %v119_v0 = vld [vmem:[%s666_s1 + $0x2c8] sm:$0xff]  ;;  %v164_v1 = vpack.c.bf16 %v103_v62, %v102_v60  ;;  %v100_v3 = vld [vmem:[%s666_s1 + $0x230] sm:$0xff]  ;;  %vm276_vm1 = vcmask 80896  }
  0x28   :  { %238 = vmatpush.bf16.msrb.mxu0 %v166_v50  ;;  %v172_v2 = vpack.c.bf16 %v119_v0, %v118_v63  ;;  %v101_v4 = vld [vmem:[%s666_s1 + $0x238] sm:$0xff]  ;;  %v116_v5 = vld [vmem:[%s666_s1 + $0x2b0] sm:$0xff]  ;;  %v98_v10 = vld [vmem:[%s666_s1 + $0x220] sm:$0xff] }
  0x29   :  { %251 = vmatpush.bf16.msrb.mxu1 %v174_v51  ;;  %v117_v6 = vld [vmem:[%s666_s1 + $0x2b8] sm:$0xff]  ;;  %v22_v7 = vld [vmem:[%s665_s0 + $0x30] sm:$0xff]  ;;  %v163_v8 = vpack.c.bf16 %v101_v4, %v100_v3  ;;  %v99_v11 = vld [vmem:[%s666_s1 + $0x228] sm:$0xff] }
  0x2a   :  { %232 = vmatmul.bf16.vlgmr.msra.gmra.mxu3 %v26_v61  ;;  %v171_v9 = vpack.c.bf16 %v117_v6, %v116_v5  ;;  %v114_v12 = vld [vmem:[%s666_s1 + $0x2a0] sm:$0xff]  ;;  %v115_v13 = vld [vmem:[%s666_s1 + $0x2a8] sm:$0xff]  ;;  %v29_v14 = vpack.c.bf16 %v22_v7, %v22_v7  ;;  %v162_v15 = vpack.c.bf16 %v99_v11, %v98_v10  ;;  %v96_v17 = vld [vmem:[%s666_s1 + $0x210] sm:$0xff] }
  0x2b   :  { %v170_v16 = vpack.c.bf16 %v115_v13, %v114_v12  ;;  %v97_v18 = vld [vmem:[%s666_s1 + $0x218] sm:$0xff]  ;;  %v112_v19 = vld [vmem:[%s666_s1 + $0x290] sm:$0xff]  ;;  %v94_v23 = vld [vmem:[%s666_s1 + $0x200] sm:$0xff] }
  0x2c   :  { %239 = vmatpush.bf16.msrb.mxu0 %v165_v58  ;;  %v113_v20 = vld [vmem:[%s666_s1 + $0x298] sm:$0xff]  ;;  %v161_v21 = vpack.c.bf16 %v97_v18, %v96_v17  ;;  %v95_v24 = vld [vmem:[%s666_s1 + $0x208] sm:$0xff]  ;;  %v110_v25 = vld [vmem:[%s666_s1 + $0x280] sm:$0xff] }
  0x2d   :  { %252 = vmatpush.bf16.msrb.mxu1 %v173_v59  ;;  %v169_v22 = vpack.c.bf16 %v113_v20, %v112_v19  ;;  %v111_v26 = vld [vmem:[%s666_s1 + $0x288] sm:$0xff]  ;;  %v160_v27 = vpack.c.bf16 %v95_v24, %v94_v23  ;;  %v20_v29 = vld [vmem:[%s665_s0 + $0x20] sm:$0xff] }
  0x2e   :  { %v168_v28 = vpack.c.bf16 %v111_v26, %v110_v25  ;;  %v21_v30 = vld [vmem:[%s665_s0 + $0x28] sm:$0xff]  ;;  %v27_v31 = vpack.c.bf16 %v20_v29, %v20_v29  ;;  %v296_v38 = vld [vmem:[%s667_s2] ss:$0 sm:$0xff]  ;;  %s323_s0 = smov [#allocation2]  }
  0x2f   :  { %v28_v32 = vpack.c.bf16 %v21_v30, %v21_v30  ;;  %s283_s7 = sshll.u32 %s323_s0, 4  ;;  %s284_s7 = int_to_ptr.vmem [resolvable:$true] %s283_s7 }
  0x30   :  { %240 = vmatpush.bf16.msrb.mxu0 %v164_v1 }
  0x31   :  { %253 = vmatpush.bf16.msrb.mxu1 %v172_v2 }
  0x34   :  { %241 = vmatpush.bf16.msrb.mxu0 %v163_v8 }
  0x35   :  { %254 = vmatpush.bf16.msrb.mxu1 %v171_v9  ;;  %294 = vmatmul.msk.bf16.vlgmr.msrb.gmra.mxu2 %vm181_vm0, %v29_v14 }
  0x38   :  { %242 = vmatpush.bf16.msrb.mxu0 %v162_v15 }
  0x39   :  { %255 = vmatpush.bf16.msrb.mxu1 %v170_v16 }
  0x3c   :  { %243 = vmatpush.bf16.msrb.mxu0 %v161_v21 }
  0x3d   :  { %256 = vmatpush.bf16.msrb.mxu1 %v169_v22 }
  0x40   :  { %244 = vmatpush.bf16.msrb.mxu0 %v160_v27 }
  0x41   :  { %257 = vmatpush.bf16.msrb.mxu1 %v168_v28 }
  0x43   :  { %245 = vmatmul.bf16.vlgmr.msrb.gmra.mxu0 %v27_v31 }
  0x44   :  { %258 = vmatmul.bf16.vlgmr.msrb.gmra.mxu1 %v28_v32 }
  0xa0   :  { %v194_v33 = vpop.f32.mrf.mxu0 }
  0xa1   :  { %v207_v34 = vpop.f32.mrf.mxu1  ;;  %v195_v41 = vadd.f32 %v296_v38, %v194_v33 }
  0xa3   :  { %v208_v42 = vadd.f32 %v207_v34, %v195_v41 }
  0xa8   :  { %v220_v35 = vpop.f32.mrf.mxu2  ;;  %v196_v36 = vpop.f32.mrf.mxu0 }
  0xa9   :  { %v209_v37 = vpop.f32.mrf.mxu1  ;;  %v221_v45 = vadd.f32 %v220_v35, %v208_v42 }
  0xad   :  { %v233_v39 = vpop.f32.mrf.mxu3 }
  0xae   :  { %v234_v46 = vadd.f32 %v233_v39, %v221_v45 }
  0xb0   :  { %v222_v40 = vpop.f32.mrf.mxu2 }
  0xb5   :  { %v235_v43 = vpop.f32.mrf.mxu3 }
  0xb8   :  { %v272_v44 = vpop.f32.mrf.mxu2 }
  0xc0   :  { %v246_v47 = vpop.f32.mrf.mxu0  ;;  %v274_v50 = vpop.f32.mrf.mxu2 }
  0xc1   :  { %v259_v48 = vpop.f32.mrf.mxu1  ;;  %v247_v49 = vadd.f32 %v246_v47, %v234_v46 }
  0xc3   :  { %v260_v51 = vadd.f32 %v259_v48, %v247_v49 }
  0xc5   :  { %v273_v52 = vadd.f32 %v272_v44, %v260_v51 }
  0xc7   :  { %277 = vst.msk [vmem:[#allocation2] sm:$0xff] %vm276_vm1, %v273_v52 }
  0xc8   :  { %v248_v53 = vpop.f32.mrf.mxu0  ;;  %288 = dma.vmem_to_hbm [thread:$0]  %s284_s7, 128, %s286_s10, [#allocation3]  }
  0xc9   :  { %v261_v54 = vpop.f32.mrf.mxu1 }
  0xca   :  { %321 = dma.done.wait [#allocation3], 128  }
  0xcb   :  { %322 = vsyncadd [#allocation3], 4294967168 }
  0xcc   :  { %293 = vsyncpa [#allocation3], 1 }

</bundles_post_ra>
